<compile_context>
chip_gen: v5e
topology: v5e:2x2
jax: 0.10.0
libtpu: 0.0.40
codegen_flags: <defaults>
</compile_context>

<pallas_src>
import functools
import math

import jax
import jax.numpy as jnp
from jax.experimental import pallas as pl
from jax.experimental.pallas import tpu as pltpu


_LANES = 128            # lane (fast) dimension of a vreg
_SUBLANES = 8           # sublane (slow) dimension of a vreg
_MAX_BLOCK_ROWS = 1024  # 1024 x 128 x 4 B = 512 KiB per operand block


def _round_up(a, b):
    return -(-a // b) * b


# ----------------------------------------------------------------------------
# Shared per-element math (used inside the kernel and as the pure-JAX reference)
# ----------------------------------------------------------------------------
def _focal_math(x, t, w, gamma):
    # Numerically stable BCE-with-logits, reduction='none':
    #   logp = max(x, 0) - x*t + log(1 + exp(-|x|))
    logp = jnp.maximum(x, 0.0) - x * t + jnp.log(1.0 + jnp.exp(-jnp.abs(x)))
    if w is not None:
        logp = logp * w                      # BCEWithLogitsLoss 'weight' rescaling
    g = float(gamma)
    if g == 0.0:
        # (1 - p) ** 0 == 1 (torch.pow semantics, including p == 1)
        return logp
    p = jnp.exp(-logp)
    base = 1.0 - p
    if g == int(g) and 1 <= int(g) <= 8:
        # common case (gamma = 1, 2, 3, ...): cheap VPU multiplies, no pow lowering
        mod = base
        for _ in range(int(g) - 1):
            mod = mod * base
    else:
        # general real gamma; base == 0 -> exp(-inf) == 0 which matches torch.pow
        mod = jnp.exp(g * jnp.log(base))
    return mod * logp


# ----------------------------------------------------------------------------
# Pallas kernels (fused BCE-with-logits + focal modulation, fully elementwise)
# ----------------------------------------------------------------------------
def _focal_kernel(x_ref, t_ref, o_ref, *, gamma):
    o_ref[...] = _focal_math(x_ref[...], t_ref[...], None, gamma).astype(o_ref.dtype)


def _focal_kernel_weighted(x_ref, t_ref, w_ref, o_ref, *, gamma):
    o_ref[...] = _focal_math(x_ref[...], t_ref[...], w_ref[...], gamma).astype(o_ref.dtype)


# ----------------------------------------------------------------------------
# Wrapper: flatten to a lane-dense (rows, 128) slab, tile rows if needed
# ----------------------------------------------------------------------------
def focal_loss(logits, targets, *, gamma=0.0, weight=None, eps=1e-7):
    """Per-element focal loss (reduction='none', like the reference module).

    `eps` is accepted to mirror the PyTorch module's signature but — exactly as in
    the reference forward() — it is never used.
    """
    del eps
    assert logits.shape == targets.shape, (logits.shape, targets.shape)
    orig_shape = logits.shape
    n = max(1, math.prod(orig_shape) if orig_shape else 1)

    x = jnp.asarray(logits, jnp.float32).reshape(-1)
    t = jnp.asarray(targets, jnp.float32).reshape(-1)
    operands = [x, t]
    if weight is not None:
        w = jnp.broadcast_to(jnp.asarray(weight, jnp.float32), orig_shape).reshape(-1)
        operands.append(w)

    # Lane-dense 2-D layout: last dim = 128 lanes (unmasked stores), rows a multiple of 8.
    rows_raw = _round_up(n, _LANES) // _LANES
    block_rows = min(_MAX_BLOCK_ROWS, _round_up(rows_raw, _SUBLANES))
    rows = _round_up(rows_raw, block_rows)
    n_pad = rows * _LANES
    operands = [jnp.pad(a, (0, n_pad - n)).reshape(rows, _LANES) for a in operands]

    grid = (rows // block_rows,)   # (1,) for small inputs -> single block, zero extra steps
    spec = pl.BlockSpec((block_rows, _LANES), lambda i: (i, 0))

    kernel = _focal_kernel_weighted if weight is not None else _focal_kernel
    out = pl.pallas_call(
        functools.partial(kernel, gamma=float(gamma)),
        out_shape=jax.ShapeDtypeStruct((rows, _LANES), jnp.float32),
        grid=grid,
        in_specs=[spec] * len(operands),
        out_specs=spec,
        compiler_params=pltpu.CompilerParams(dimension_semantics=("parallel",)),
    )(*operands)

    return out.reshape(-1)[:n].reshape(orig_shape)


# ----------------------------------------------------------------------------
# Demo / self-check
# ----------------------------------------------------------------------------
if __name__ == "__main__":
    key = jax.random.PRNGKey(0)
    kx, kt, kw = jax.random.split(key, 3)

    shape = (2, 4, 16, 16)
    logits = 2.0 * jax.random.normal(kx, shape, jnp.float32)
    targets = (jax.random.uniform(kt, shape) > 0.5).astype(jnp.float32)
    weight = jax.random.uniform(kw, shape, jnp.float32) + 0.5

    # gamma = 2 (classic focal loss), no weight
    f2 = jax.jit(functools.partial(focal_loss, gamma=2.0))
    out2 = f2(logits, targets)
    jax.block_until_ready(out2)
    ref2 = _focal_math(logits, targets, None, 2.0)
    assert out2.shape == shape and out2.dtype == jnp.float32
    assert jnp.allclose(out2, ref2, atol=1e-5, rtol=1e-5)

    # gamma = 0 (module default -> plain BCE-with-logits), with elementwise weight
    f0 = jax.jit(lambda a, b, w: focal_loss(a, b, gamma=0.0, weight=w))
    out0 = f0(logits, targets, weight)
    jax.block_until_ready(out0)
    ref0 = _focal_math(logits, targets, weight, 0.0)
    assert jnp.allclose(out0, ref0, atol=1e-5, rtol=1e-5)

    print("KERNEL_OK")
</pallas_src>

<mosaic_0001>
module attributes {stable_mosaic.version = 11 : i64} {
  func.func @_focal_kernel(%arg0: i32, %arg1: memref<16x128xf32, #tpu.memory_space<vmem>>, %arg2: memref<16x128xf32, #tpu.memory_space<vmem>>, %arg3: memref<16x128xf32, #tpu.memory_space<vmem>>) attributes {dimension_semantics = [#tpu.dimension_semantics<parallel>], iteration_bounds = array<i64: 1>, scalar_prefetch = 0 : i64, scratch_operands = 0 : i64, tpu.core_type = #tpu.core_type<tc>, window_params = [{transform_indices = @transform_0, window_bounds = array<i64: 16, 128>}, {transform_indices = @transform_1, window_bounds = array<i64: 16, 128>}, {transform_indices = @transform_2, window_bounds = array<i64: 16, 128>}]} {
    %c0 = arith.constant 0 : index
    %c0_0 = arith.constant 0 : index
    %0 = vector.load %arg1[%c0, %c0_0] : memref<16x128xf32, #tpu.memory_space<vmem>>, vector<16x128xf32>
    %c0_1 = arith.constant 0 : index
    %c0_2 = arith.constant 0 : index
    %1 = vector.load %arg2[%c0_1, %c0_2] : memref<16x128xf32, #tpu.memory_space<vmem>>, vector<16x128xf32>
    %cst = arith.constant 0.000000e+00 : f32
    %2 = vector.broadcast %cst : f32 to vector<16x128xf32>
    %3 = arith.maximumf %0, %2 : vector<16x128xf32>
    %4 = arith.mulf %0, %1 : vector<16x128xf32>
    %5 = arith.subf %3, %4 : vector<16x128xf32>
    %6 = math.absf %0 : vector<16x128xf32>
    %cst_3 = arith.constant 0.000000e+00 : f32
    %7 = vector.broadcast %cst_3 : f32 to vector<16x128xf32>
    %8 = arith.subf %7, %6 : vector<16x128xf32>
    %9 = math.exp %8 : vector<16x128xf32>
    %cst_4 = arith.constant 1.000000e+00 : f32
    %10 = vector.broadcast %cst_4 : f32 to vector<16x128xf32>
    %11 = arith.addf %10, %9 : vector<16x128xf32>
    %12 = math.log %11 : vector<16x128xf32>
    %13 = arith.addf %5, %12 : vector<16x128xf32>
    %cst_5 = arith.constant 0.000000e+00 : f32
    %14 = vector.broadcast %cst_5 : f32 to vector<16x128xf32>
    %15 = arith.subf %14, %13 : vector<16x128xf32>
    %16 = math.exp %15 : vector<16x128xf32>
    %cst_6 = arith.constant 1.000000e+00 : f32
    %17 = vector.broadcast %cst_6 : f32 to vector<16x128xf32>
    %18 = arith.subf %17, %16 : vector<16x128xf32>
    %19 = arith.mulf %18, %18 : vector<16x128xf32>
    %20 = arith.mulf %19, %13 : vector<16x128xf32>
    %c0_7 = arith.constant 0 : index
    %c0_8 = arith.constant 0 : index
    %21 = vector.load %arg3[%c0_7, %c0_8] : memref<16x128xf32, #tpu.memory_space<vmem>>, vector<16x128xf32>
    tpu.vector_store %arg3[%c0_7, %c0_8], %20 {strides = array<i32>} : memref<16x128xf32, #tpu.memory_space<vmem>>, vector<16x128xf32>,
    return
  }
  func.func @transform_0(%arg0: i32) -> (i32, i32) {
    %c0_i32 = arith.constant 0 : i32
    %c0_i32_0 = arith.constant 0 : i32
    return %arg0, %c0_i32 : i32, i32
  }
  func.func @transform_1(%arg0: i32) -> (i32, i32) {
    %c0_i32 = arith.constant 0 : i32
    %c0_i32_0 = arith.constant 0 : i32
    return %arg0, %c0_i32 : i32, i32
  }
  func.func @transform_2(%arg0: i32) -> (i32, i32) {
    %c0_i32 = arith.constant 0 : i32
    %c0_i32_0 = arith.constant 0 : i32
    return %arg0, %c0_i32 : i32, i32
  }
}

</mosaic_0001>

<bundles_post_ra>
// kernel: focal_loss.1
= control target key start
LH: loop header
LB: loop body
LE: loop exit
PB: predicated region body
PF: predicated region fallthrough
CT: control target
= control target key end

     0   :  { %s100_s0 = inlined_call_operand.vmem [shape: f32[16,128], index: 0, kind: input, shape index: {}]   ;;  %s101_s1 = inlined_call_operand.vmem [shape: f32[16,128], index: 1, kind: input, shape index: {}]   ;;  %s102_s2 = inlined_call_operand.vmem [shape: f32[16,128], index: 2, kind: output, shape index: {}]  }
   0x1   :  { %v11_v0 = vld [vmem:[%s100_s0] sm:$0xff]  ;;  %v12_v1 = vld [vmem:[%s100_s0 + $0x8] sm:$0xff] }
   0x2   :  { %v21_v2 = vand.u32 2147483647, %v11_v0  ;;  %v22_v3 = vand.u32 2147483647, %v12_v1  ;;  %v13_v10 = vld [vmem:[%s101_s1] sm:$0xff]  ;;  %v14_v12 = vld [vmem:[%s101_s1 + $0x8] sm:$0xff] }
   0x3   :  { %v15_v14 = vmax.f32 %v11_v0, 0.0  ;;  %v17_v15 = vmul.f32 %v13_v10, %v11_v0  ;;  %v16_v16 = vmax.f32 %v12_v1, 0.0  ;;  %v18_v17 = vmul.f32 %v14_v12, %v12_v1 }
   0x4   :  { %v23_v4 = vsub.f32 0.0, %v21_v2  ;;  %v24_v5 = vsub.f32 0.0, %v22_v3 }
   0x5   :  { %v19_v18 = vsub.f32 %v15_v14, %v17_v15  ;;  %v20_v20 = vsub.f32 %v16_v16, %v18_v17 }
   0x6   :  { %v25_v6 = vmul.f32 1.442695, %v23_v4  ;;  %v27_v7 = vmul.f32 1.442695, %v24_v5 }
   0x8   :  { %55 = vpow2.f32 %v25_v6 }
   0x9   :  { %57 = vpow2.f32 %v27_v7 }
   0xe   :  { %v56_v8 = vpop.eup %55 }
   0xf   :  { %v58_v9 = vpop.eup %57  ;;  %v29_v11 = vadd.f32 1.0, %v56_v8 }
  0x10   :  { %v30_v13 = vadd.f32 1.0, %v58_v9 }
  0x11   :  { %59 = vlog2.f32 %v29_v11 }
  0x12   :  { %61 = vlog2.f32 %v30_v13 }
  0x17   :  { %v60_v19 = vpop.eup %59 }
  0x18   :  { %v62_v21 = vpop.eup %61  ;;  %v32_v22 = vmul.f32 0.6931472, %v60_v19 }
  0x19   :  { %v34_v23 = vmul.f32 0.6931472, %v62_v21 }
  0x1a   :  { %v35_v24 = vadd.f32 %v32_v22, %v19_v18 }
  0x1b   :  { %v36_v25 = vadd.f32 %v34_v23, %v20_v20 }
  0x1c   :  { %v37_v26 = vsub.f32 0.0, %v35_v24 }
  0x1d   :  { %v38_v27 = vsub.f32 0.0, %v36_v25 }
  0x1e   :  { %v39_v28 = vmul.f32 1.442695, %v37_v26 }
  0x1f   :  { %v41_v29 = vmul.f32 1.442695, %v38_v27 }
  0x20   :  { %63 = vpow2.f32 %v39_v28 }
  0x21   :  { %65 = vpow2.f32 %v41_v29 }
  0x26   :  { %v64_v30 = vpop.eup %63 }
  0x27   :  { %v66_v31 = vpop.eup %65  ;;  %v43_v32 = vsub.f32 1.0, %v64_v30 }
  0x28   :  { %v44_v33 = vsub.f32 1.0, %v66_v31 }
  0x29   :  { %v45_v34 = vmul.f32 %v43_v32, %v43_v32 }
  0x2a   :  { %v46_v35 = vmul.f32 %v44_v33, %v44_v33 }
  0x2b   :  { %v47_v36 = vmul.f32 %v45_v34, %v35_v24 }
  0x2c   :  { %v48_v37 = vmul.f32 %v46_v35, %v36_v25 }
  0x2d   :  { %49 = vst [vmem:[%s102_s2] sm:$0xff] %v47_v36 }
  0x2e   :  { %50 = vst [vmem:[%s102_s2 + $0x8] sm:$0xff] %v48_v37 }

</bundles_post_ra>
